<compile_context>
chip_gen: v7x
topology: tpu7x:2x2x1
jax: 0.10.0
libtpu: 0.0.40
codegen_flags: <defaults>
</compile_context>

<pallas_src>
import functools
import math

import numpy as np
import jax
import jax.numpy as jnp
from jax import lax
from jax.experimental import pallas as pl
from jax.experimental.pallas import tpu as pltpu

# TODO(synk): fundus_build_model() comes from an unavailable file; a standard pre-norm ViT
# encoder is used with embed_dim=1024 (forced by nn.Linear(1024, classes) in the spec),
# depth=2, 8 heads, patch=4, tanh-approx GELU.  The transformer_2DNet forward semantics
# (features[0] -> intermediate_fc -> mean over dim=1 -> CE loss) are reproduced exactly.
EMBED_DIM = 1024
NUM_HEADS = 8
DEPTH = 2
PATCH = 4
MLP_RATIO = 4


def _round_up(v, m):
    return ((v + m - 1) // m) * m


# ----------------------------------------------------------------------------- matmul kernel
def _matmul_kernel(x_ref, w_ref, b_ref, *rest, activation, has_residual):
    """o = act(x @ w + b) (+ residual), bf16 operands on the MXU, f32 accumulation/epilogue."""
    if has_residual:
        r_ref, o_ref, acc_ref = rest
    else:
        o_ref, acc_ref = rest
        r_ref = None

    k = pl.program_id(2)

    @pl.when(k == 0)
    def _():
        acc_ref[...] = jnp.zeros_like(acc_ref)

    acc_ref[...] += jnp.dot(x_ref[...], w_ref[...], preferred_element_type=jnp.float32)

    @pl.when(k == pl.num_programs(2) - 1)
    def _():
        out = acc_ref[...] + b_ref[...]
        if activation == "gelu":   # tanh approximation (EUP-friendly)
            out = 0.5 * out * (1.0 + jnp.tanh(
                0.7978845608028654 * (out + 0.044715 * out * out * out)))
        elif activation == "relu":
            out = jnp.maximum(out, 0.0)
        if r_ref is not None:
            out = out + r_ref[...].astype(jnp.float32)
        o_ref[...] = out.astype(o_ref.dtype)


def pallas_matmul(x, w, bias, residual=None, activation=None, out_dtype=jnp.float32):
    """x:(M,K) @ w:(K,N) + bias, optional activation and fused residual add, via Pallas."""
    M, K = x.shape
    Kw, N = w.shape
    assert K == Kw
    xb = x.astype(jnp.bfloat16)          # bf16 MXU operands (review item 1)
    wb = w.astype(jnp.bfloat16)

    tm = min(512, _round_up(M, 16))      # 16-aligned for bf16 sublane packing
    tn = min(512, _round_up(N, 128))
    if K <= 1024:                        # single K step: epilogue runs once, no K padding to 128
        Kp = _round_up(K, 16)
        tk = Kp
    else:
        tk = 1024
        Kp = _round_up(K, tk)
    Mp = _round_up(M, tm)
    Np = _round_up(N, tn)

    xp = jnp.pad(xb, ((0, Mp - M), (0, Kp - K)))
    wp = jnp.pad(wb, ((0, Kp - K), (0, Np - N)))
    bp = jnp.pad(bias.reshape(1, -1).astype(jnp.float32), ((0, 0), (0, Np - N)))

    in_specs = [
        pl.BlockSpec((tm, tk), lambda i, j, k: (i, k)),
        pl.BlockSpec((tk, tn), lambda i, j, k: (k, j)),
        pl.BlockSpec((1, tn), lambda i, j, k: (0, j)),
    ]
    operands = [xp, wp, bp]
    has_res = residual is not None
    if has_res:
        rp = jnp.pad(residual.astype(jnp.float32), ((0, Mp - M), (0, Np - N)))
        in_specs.append(pl.BlockSpec((tm, tn), lambda i, j, k: (i, j)))  # k-invariant
        operands.append(rp)

    kernel = functools.partial(_matmul_kernel, activation=activation, has_residual=has_res)
    grid = (Mp // tm, Np // tn, Kp // tk)

    out = pl.pallas_call(
        kernel,
        out_shape=jax.ShapeDtypeStruct((Mp, Np), out_dtype),
        grid_spec=pltpu.PrefetchScalarGridSpec(
            num_scalar_prefetch=0,
            grid=grid,
            in_specs=in_specs,
            out_specs=pl.BlockSpec((tm, tn), lambda i, j, k: (i, j)),
            scratch_shapes=[pltpu.VMEM((tm, tn), jnp.float32)],
        ),
        compiler_params=pltpu.CompilerParams(
            dimension_semantics=("parallel", "parallel", "arbitrary"),
            vmem_limit_bytes=48 * 1024 * 1024,
        ),
    )(*operands)
    return out[:M, :N]


# ----------------------------------------------------------------------------- layernorm kernel
def _ln_kernel(x_ref, g_ref, b_ref, o_ref, *, eps):
    x = x_ref[...].astype(jnp.float32)                       # (tm, D)
    mu = jnp.mean(x, axis=-1, keepdims=True)
    xc = x - mu
    var = jnp.mean(xc * xc, axis=-1, keepdims=True)
    inv = lax.rsqrt(var + eps)
    o_ref[...] = ((xc * inv) * g_ref[...] + b_ref[...]).astype(o_ref.dtype)


def pallas_layernorm(x, gamma, beta, eps=1e-5, out_dtype=jnp.bfloat16):
    M, D = x.shape
    tm = min(256, _round_up(M, 16))
    Mp = _round_up(M, tm)
    xp = jnp.pad(x.astype(jnp.float32), ((0, Mp - M), (0, 0)))
    g = gamma.reshape(1, -1).astype(jnp.float32)
    b = beta.reshape(1, -1).astype(jnp.float32)
    out = pl.pallas_call(
        functools.partial(_ln_kernel, eps=eps),
        out_shape=jax.ShapeDtypeStruct((Mp, D), out_dtype),
        grid_spec=pltpu.PrefetchScalarGridSpec(
            num_scalar_prefetch=0,
            grid=(Mp // tm,),
            in_specs=[pl.BlockSpec((tm, D), lambda i: (i, 0)),
                      pl.BlockSpec((1, D), lambda i: (0, 0)),
                      pl.BlockSpec((1, D), lambda i: (0, 0))],
            out_specs=pl.BlockSpec((tm, D), lambda i: (i, 0)),
        ),
        compiler_params=pltpu.CompilerParams(dimension_semantics=("parallel",)),
    )(xp, g, b)
    return out[:M]


# ----------------------------------------------------------------------------- attention kernel
def _attn_kernel(q_ref, k_ref, v_ref, o_ref, *, scale):
    q = q_ref[...]                                            # (1, N, Dh) bf16
    k = k_ref[...]
    v = v_ref[...]
    s = jnp.einsum('bnd,bmd->bnm', q, k,
                   preferred_element_type=jnp.float32) * scale
    m = jnp.max(s, axis=-1, keepdims=True)
    p = jnp.exp(s - m)
    l = jnp.sum(p, axis=-1, keepdims=True)
    p = p / l
    o = jnp.einsum('bnm,bmd->bnd', p.astype(jnp.bfloat16), v,
                   preferred_element_type=jnp.float32)
    o_ref[...] = o.astype(o_ref.dtype)


def pallas_attention(q, k, v):
    """q,k,v: (B*H, N, Dh) bf16 -> softmax(q k^T / sqrt(Dh)) v, one grid step per head."""
    BH, N, Dh = q.shape
    scale = 1.0 / math.sqrt(Dh)
    return pl.pallas_call(
        functools.partial(_attn_kernel, scale=scale),
        out_shape=jax.ShapeDtypeStruct((BH, N, Dh), jnp.bfloat16),
        grid_spec=pltpu.PrefetchScalarGridSpec(
            num_scalar_prefetch=0,
            grid=(BH,),
            in_specs=[pl.BlockSpec((1, N, Dh), lambda b: (b, 0, 0))] * 3,
            out_specs=pl.BlockSpec((1, N, Dh), lambda b: (b, 0, 0)),
        ),
        compiler_params=pltpu.CompilerParams(dimension_semantics=("parallel",)),
    )(q, k, v)


# ----------------------------------------------------------------------------- cross entropy
def _ce_kernel(logits_ref, y_ref, loss_ref):
    """Mean softmax cross-entropy (matches nn.CrossEntropyLoss(reduction='mean'))."""
    logits = logits_ref[...].astype(jnp.float32)              # (B, C)
    y = y_ref[...]                                            # (B, 1) int32
    m = jnp.max(logits, axis=-1, keepdims=True)
    lse = jnp.log(jnp.sum(jnp.exp(logits - m), axis=-1, keepdims=True)) + m
    cls = lax.broadcasted_iota(jnp.int32, logits.shape, 1)
    onehot = (cls == y).astype(jnp.float32)
    correct = jnp.sum(logits * onehot, axis=-1, keepdims=True)
    nll = lse - correct                                       # (B, 1)
    loss_ref[...] = jnp.sum(nll, axis=0, keepdims=True) / logits.shape[0]


def pallas_cross_entropy(logits, y):
    loss = pl.pallas_call(
        _ce_kernel,
        out_shape=jax.ShapeDtypeStruct((1, 1), jnp.float32),
    )(logits.astype(jnp.float32), y.astype(jnp.int32).reshape(-1, 1))
    return loss[0, 0]


# ----------------------------------------------------------------------------- parameters
class ParamGen:
    def __init__(self, seed=0):
        self.key = jax.random.PRNGKey(seed)

    def next(self):
        self.key, k = jax.random.split(self.key)
        return k


def _linear(pg, cin, cout):
    # weights stored directly in bf16 (MXU-ready), biases in f32 (epilogue precision)
    w = (jax.random.normal(pg.next(), (cin, cout), jnp.float32)
         * np.sqrt(1.0 / cin)).astype(jnp.bfloat16)
    b = 0.01 * jax.random.normal(pg.next(), (cout,), jnp.float32)
    return w, b


def build_params(classes, n_tokens, seed=0):
    pg = ParamGen(seed)
    D, HID = EMBED_DIM, EMBED_DIM * MLP_RATIO
    p = {}
    p['patch_w'], p['patch_b'] = _linear(pg, PATCH * PATCH * 3, D)
    p['pos_emb'] = 0.02 * jax.random.normal(pg.next(), (n_tokens, D), jnp.float32)
    blocks = []
    for _ in range(DEPTH):
        blk = {
            'ln1_g': jnp.ones((D,), jnp.float32), 'ln1_b': jnp.zeros((D,), jnp.float32),
            'ln2_g': jnp.ones((D,), jnp.float32), 'ln2_b': jnp.zeros((D,), jnp.float32),
        }
        blk['qkv_w'], blk['qkv_b'] = _linear(pg, D, 3 * D)
        blk['proj_w'], blk['proj_b'] = _linear(pg, D, D)
        blk['fc1_w'], blk['fc1_b'] = _linear(pg, D, HID)
        blk['fc2_w'], blk['fc2_b'] = _linear(pg, HID, D)
        blocks.append(blk)
    p['blocks'] = blocks
    p['lnf_g'] = jnp.ones((D,), jnp.float32)
    p['lnf_b'] = jnp.zeros((D,), jnp.float32)
    p['fc_w'], p['fc_b'] = _linear(pg, D, classes)            # intermediate_fc(1024, classes)
    return p


# ----------------------------------------------------------------------------- model forward
def _block_forward(p, x, B, N):
    """Pre-norm transformer block; residual adds fused into the matmul epilogues."""
    D = x.shape[-1]
    H, Dh = NUM_HEADS, D // NUM_HEADS

    h = pallas_layernorm(x, p['ln1_g'], p['ln1_b'])                                # bf16
    qkv = pallas_matmul(h, p['qkv_w'], p['qkv_b'], out_dtype=jnp.bfloat16)         # (B*N, 3D)
    qkv = qkv.reshape(B, N, 3, H, Dh)
    qkv = jnp.transpose(qkv, (2, 0, 3, 1, 4))                 # (3, B, H, N, Dh) — layout glue
    q = qkv[0].reshape(B * H, N, Dh)
    k = qkv[1].reshape(B * H, N, Dh)
    v = qkv[2].reshape(B * H, N, Dh)
    attn = pallas_attention(q, k, v)                                               # (B*H,N,Dh)
    attn = jnp.transpose(attn.reshape(B, H, N, Dh), (0, 2, 1, 3)).reshape(B * N, D)
    x = pallas_matmul(attn, p['proj_w'], p['proj_b'], residual=x)                  # fused +res

    h = pallas_layernorm(x, p['ln2_g'], p['ln2_b'])
    h = pallas_matmul(h, p['fc1_w'], p['fc1_b'], activation='gelu',
                      out_dtype=jnp.bfloat16)
    x = pallas_matmul(h, p['fc2_w'], p['fc2_b'], residual=x)                       # fused +res
    return x


def transformer_2dnet_forward(params, X, y):
    """Equivalent of transformer_2DNet.forward(X, y) -> (final_pred, loss)."""
    # layout: X[0] is NCHW (PyTorch) -> NHWC internally.
    x = jnp.transpose(X[0], (0, 2, 3, 1)).astype(jnp.float32)
    B, Himg, Wimg, C = x.shape
    nH, nW = Himg // PATCH, Wimg // PATCH
    N = nH * nW

    # Patch embedding: non-overlapping patches => pure reshape (no im2col expansion) + matmul.
    xp = x.reshape(B, nH, PATCH, nW, PATCH, C)
    xp = jnp.transpose(xp, (0, 1, 3, 2, 4, 5)).reshape(B * N, PATCH * PATCH * C)
    tok = pallas_matmul(xp, params['patch_w'], params['patch_b'])                  # (B*N, D) f32
    # TODO(synk): positional-embedding add is plain-JAX glue (tiny elementwise op).
    tok = tok + jnp.tile(params['pos_emb'], (B, 1))

    for blk in params['blocks']:
        tok = _block_forward(blk, tok, B, N)
    feat = pallas_layernorm(tok, params['lnf_g'], params['lnf_b'])                 # (B*N, D)

    # intermediate_fc applied token-wise, then mean over the token dim (= torch order).
    logits_tok = pallas_matmul(feat, params['fc_w'], params['fc_b'])               # (B*N, cls)
    # TODO(synk): token mean over dim=1 is a plain jnp.mean on a tiny (B, N, classes) tensor.
    final_pred = jnp.mean(logits_tok.reshape(B, N, -1), axis=1)                    # (B, cls)

    loss = pallas_cross_entropy(final_pred, y)        # mean CE; torch.mean(loss) is a no-op
    return final_pred, loss


# ----------------------------------------------------------------------------- main
if __name__ == "__main__":
    classes = 4
    B = 2
    IMG = 32                                           # 32x32 fundus image -> 8x8 = 64 tokens
    n_tokens = (IMG // PATCH) ** 2

    key = jax.random.PRNGKey(0)
    k1, k2 = jax.random.split(key)
    x_img = jax.random.normal(k1, (B, 3, IMG, IMG), jnp.float32)     # X[0], NCHW
    y = jax.random.randint(k2, (B,), 0, classes, jnp.int32)

    params = build_params(classes, n_tokens, seed=0)
    pred, loss = transformer_2dnet_forward(params, [x_img], y)
    pred = jax.block_until_ready(pred)
    loss = jax.block_until_ready(loss)

    assert pred.shape == (B, classes)
    assert loss.shape == ()
    assert bool(jnp.isfinite(loss))
    print("KERNEL_OK")
</pallas_src>

<mosaic_0001>
module attributes {stable_mosaic.version = 11 : i64} {
  func.func @_matmul_kernel(%arg0: i32, %arg1: i32, %arg2: i32, %arg3: memref<128x48xbf16, #tpu.memory_space<vmem>>, %arg4: memref<48x512xbf16, #tpu.memory_space<vmem>>, %arg5: memref<1x512xf32, #tpu.memory_space<vmem>>, %arg6: memref<128x512xf32, #tpu.memory_space<vmem>>, %arg7: memref<128x512xf32, #tpu.memory_space<vmem>>) attributes {dimension_semantics = [#tpu.dimension_semantics<parallel>, #tpu.dimension_semantics<parallel>, #tpu.dimension_semantics<arbitrary>], iteration_bounds = array<i64: 1, 2, 1>, scalar_prefetch = 0 : i64, scratch_operands = 1 : i64, tpu.core_type = #tpu.core_type<tc>, window_params = [{transform_indices = @transform_0, window_bounds = array<i64: 128, 48>}, {transform_indices = @transform_1, window_bounds = array<i64: 48, 512>}, {transform_indices = @transform_2, window_bounds = array<i64: 1, 512>}, {transform_indices = @transform_3, window_bounds = array<i64: 128, 512>}]} {
    %c0_i32 = arith.constant 0 : i32
    %0 = arith.cmpi eq, %arg2, %c0_i32 : i32
    %1 = arith.extui %0 : i1 to i32
    %c0_i32_0 = arith.constant 0 : i32
    %2 = arith.cmpi ne, %1, %c0_i32_0 : i32
    scf.if %2 {
      %cst_10 = arith.constant 0.000000e+00 : f32
      %12 = vector.broadcast %cst_10 : f32 to vector<128x512xf32>
      %c0_11 = arith.constant 0 : index
      %c0_12 = arith.constant 0 : index
      %13 = vector.load %arg7[%c0_11, %c0_12] : memref<128x512xf32, #tpu.memory_space<vmem>>, vector<128x512xf32>
      tpu.vector_store %arg7[%c0_11, %c0_12], %12 {strides = array<i32>} : memref<128x512xf32, #tpu.memory_space<vmem>>, vector<128x512xf32>,
    } else {
    }
    %c0 = arith.constant 0 : index
    %c0_1 = arith.constant 0 : index
    %3 = vector.load %arg7[%c0, %c0_1] : memref<128x512xf32, #tpu.memory_space<vmem>>, vector<128x512xf32>
    %c0_2 = arith.constant 0 : index
    %c0_3 = arith.constant 0 : index
    %4 = vector.load %arg3[%c0_2, %c0_3] : memref<128x48xbf16, #tpu.memory_space<vmem>>, vector<128x48xbf16>
    %c0_4 = arith.constant 0 : index
    %c0_5 = arith.constant 0 : index
    %5 = vector.load %arg4[%c0_4, %c0_5] : memref<48x512xbf16, #tpu.memory_space<vmem>>, vector<48x512xbf16>
    %cst = arith.constant dense<0.000000e+00> : vector<128x512xf32>
    %6 = tpu.matmul %4, %5, %cst {dimension_numbers = #tpu.dot_dimension_numbers<[1], [0], [0], [1], [0, 0, 1, 1], [], []>} : vector<128x48xbf16>, vector<48x512xbf16>, vector<128x512xf32> -> vector<128x512xf32>
    %7 = arith.addf %3, %6 : vector<128x512xf32>
    %c0_6 = arith.constant 0 : index
    %c0_7 = arith.constant 0 : index
    %8 = vector.load %arg7[%c0_6, %c0_7] : memref<128x512xf32, #tpu.memory_space<vmem>>, vector<128x512xf32>
    tpu.vector_store %arg7[%c0_6, %c0_7], %7 {strides = array<i32>} : memref<128x512xf32, #tpu.memory_space<vmem>>, vector<128x512xf32>,
    %c0_i32_8 = arith.constant 0 : i32
    %9 = arith.cmpi eq, %arg2, %c0_i32_8 : i32
    %10 = arith.extui %9 : i1 to i32
    %c0_i32_9 = arith.constant 0 : i32
    %11 = arith.cmpi ne, %10, %c0_i32_9 : i32
    scf.if %11 {
      %c0_10 = arith.constant 0 : index
      %c0_11 = arith.constant 0 : index
      %12 = vector.load %arg7[%c0_10, %c0_11] : memref<128x512xf32, #tpu.memory_space<vmem>>, vector<128x512xf32>
      %c0_12 = arith.constant 0 : index
      %c0_13 = arith.constant 0 : index
      %13 = vector.load %arg5[%c0_12, %c0_13] : memref<1x512xf32, #tpu.memory_space<vmem>>, vector<1x512xf32>
      %14 = vector.broadcast %13 : vector<1x512xf32> to vector<128x512xf32>
      %15 = arith.addf %12, %14 : vector<128x512xf32>
      %c0_14 = arith.constant 0 : index
      %c0_15 = arith.constant 0 : index
      %16 = vector.load %arg6[%c0_14, %c0_15] : memref<128x512xf32, #tpu.memory_space<vmem>>, vector<128x512xf32>
      tpu.vector_store %arg6[%c0_14, %c0_15], %15 {strides = array<i32>} : memref<128x512xf32, #tpu.memory_space<vmem>>, vector<128x512xf32>,
    } else {
    }
    return
  }
  func.func @transform_0(%arg0: i32, %arg1: i32, %arg2: i32) -> (i32, i32) {
    %c0_i32 = arith.constant 0 : i32
    return %arg0, %arg2 : i32, i32
  }
  func.func @transform_1(%arg0: i32, %arg1: i32, %arg2: i32) -> (i32, i32) {
    %c0_i32 = arith.constant 0 : i32
    return %arg2, %arg1 : i32, i32
  }
  func.func @transform_2(%arg0: i32, %arg1: i32, %arg2: i32) -> (i32, i32) {
    %c0_i32 = arith.constant 0 : i32
    %c0_i32_0 = arith.constant 0 : i32
    return %c0_i32, %arg1 : i32, i32
  }
  func.func @transform_3(%arg0: i32, %arg1: i32, %arg2: i32) -> (i32, i32) {
    %c0_i32 = arith.constant 0 : i32
    return %arg0, %arg1 : i32, i32
  }
}

</mosaic_0001>

<bundles_post_ra>
// kernel: tpu_custom_call.1
= control target key start
LH: loop header
LB: loop body
LE: loop exit
PB: predicated region body
PF: predicated region fallthrough
CT: control target
= control target key end

     0   :  { %8 = vsyncpa [#allocation4], 0  ;;  %s1912_s0 = inlined_call_operand.vmem [shape: bf16[128,48], index: 0, kind: input, shape index: {}]   ;;  %s1913_s1 = inlined_call_operand.hbm [shape: bf16[48,1024], index: 1, kind: input, shape index: {}]   ;;  %s1914_s2 = inlined_call_operand.vmem [shape: f32[1,1024], index: 2, kind: input, shape index: {}]   ;;  %s1915_s3 = inlined_call_operand.hbm [shape: f32[128,1024], index: 3, kind: output, shape index: {}]  }
   0x1   :  { %10 = vsyncpa [#allocation4 + $0x1], 0 }
   0x2   :  { %11 = vsyncpa [#allocation5], 0 }
   0x3   :  { %13 = vsyncpa [#allocation5 + $0x1], 0  ;;  %s1555_s12 = smov 0   ;;  %s1557_s13 = smov 0  }
   0x4   :  { %s1559_s14 = smov 0   ;;  %s1561_s15 = smov 0  }
   0x5   :  { %s1563_s16 = smov 0   ;;  %s1565_s17 = smov 0  }
   0x6 LB: > { %s1262_s18 = sadd.s32 4294967295, %s1524_s17   ;;  %s1263_s19 = sadd.s32 4294967294, %s1524_s17   ;;  %s1524_s17 = sphi %s1565_s17, %s19_s17   ;;  %s1520_s16 = sphi %s1563_s16, %s1929_s16   ;;  %s1516_s15 = sphi %s1561_s15, %s1928_s15   ;;  %s1512_s14 = sphi %s1559_s14, %s1927_s14   ;;  %s1508_s13 = sphi %s1557_s13, %s1926_s13   ;;  %s1504_s12 = sphi %s1555_s12, %s1925_s12  }
   0x7   : > { %s34_s20 = sadd.s32 1, %s1520_s16  ;;  %s75_s21 = sadd.s32 1, %s1512_s14 }
   0x8   : > { %p36_p0 = scmp.ge.s32.totalorder %s34_s20, 2  ;;  %p82_p1 = scmp.ne.s32.totalorder %s1512_s14, %s1508_s13 }
   0x9   : > { %p83_p2 = scmp.eq.s32.totalorder %s1524_s17, 0  ;;  %p88_p3 = scmp.ne.s32.totalorder %s1508_s13, %s1504_s12 }
   0xa   : > { %s1931_s20 = smov (%p36_p0, %s34_s20), 0  ;;  %p89_p5 = scmp.eq.s32.totalorder %s1262_s18, 0 }
   0xb   : > { %p1596_p4 = por %p83_p2, %p82_p1  ;;  %s71_s23 = ssub.s32 %s1520_s16, %s1931_s20 }
   0xc   : > { %p140_p6 = scmp.eq.s32.totalorder %s1262_s18, 1  ;;  %p73_p7 = scmp.eq.s32.totalorder %s71_s23, 0 }
   0xd   : > { %p1602_p8 = por %p89_p5, %p88_p3  ;;  %p146_p10 = scmp.eq.s32.totalorder %s1263_s19, 1 }
   0xe   : > { %p1606_p9 = por %p140_p6, %p82_p1  ;;  %p1329_p13 = scmp.lt.s32.totalorder %s1524_s17, 2 }
   0xf   : > { %s1611_s26 = scalar_select %p73_p7, %s1512_s14, %s75_s21  }
  0x10   : > { %s1919_s25 = scalar_select %p1606_p9, 1, 0 }
  0x11   : > { %p1613_p11 = por %p146_p10, %p88_p3  ;;  %s178_s28 = sand.u32 1, %s1512_s14  }
  0x12   : > { %s1315_s29 = smul.u32 96, %s178_s28  ;;  %s1313_s30 = sshll.u32 %s1520_s16, 8 }
  0x13   : > { %s1920_s27 = scalar_select %p1613_p11, 1, 0 }
  0x14   : > { %p1623_p0 = pnand %p1329_p13, %p1596_p4  ;;  %s1630_s7 = scalar_lea.hbm %s1913_s1, %s1313_s30 }
  0x15   : > { %s182_s8 = scalar_lea.vmem [#allocation3], %s1315_s29  ;;  %s1634_s10 = scalar_lea.sflag [#allocation4], %s178_s28 }
  0x16   : > { %s192_s9 = sshll.u32 %s182_s8, 4  ;;  %s1412_s11 = scalar_lea.hbm %s1630_s7, 1536  ;;  %s1632_s9 = int_to_ptr.vmem [resolvable:$true] %s192_s9 }
  0x17   : > { %p1413_p1 = scmp.ne.s32.totalorder %s1630_s7, %s1412_s11  ;;  %p1414_p2 = pneg %p1623_p0 }
  0x18   : > { %s1417_s21 = scalar_lea.hbm %s1913_s1, 3072  ;;  %p1418_p5 = scmp.lt.u32.totalorder %s1630_s7, %s1913_s1 }
  0x19   : > { %p1415_p3 = pnand %p1414_p2, %p1413_p1  ;;  %p1419_p6 = scmp.lt.u32.totalorder %s1417_s21, %s1412_s11 }
  0x1a   : > { %p1421_p10 = scmp.lt.u32.totalorder %s1412_s11, %s1630_s7 }
  0x1b   : > { %p1416_p4 = pneg %p1415_p3  ;;  %p1420_p7 = por %p1419_p6, %p1418_p5 }
  0x1d   : > { %p1422_p13 = por %p1421_p10, %p1420_p7 }
  0x1f   : > { %p1423_p12 = pnand %p1422_p13, %p1416_p4 }
  0x21   : > { %1426 = shalt.err (!%p1423_p12)
}
  0x22   : > { %s1427_s28 = scalar_lea.vmem %s1632_s9, 1536  ;;  %s1526_s29 = smov [#allocation3]  }
  0x23   : > { %p1428_p1 = scmp.ne.s32.totalorder %s1632_s9, %s1427_s28  ;;  %s1432_s30 = sshll.u32 %s1526_s29, 4  ;;  %s1433_s30 = int_to_ptr.vmem [resolvable:$false] %s1432_s30 }
  0x24   : > { %s1434_s5 = scalar_lea.vmem %s1433_s30, 3072  ;;  %p1435_p9 = scmp.lt.s32.totalorder %s1632_s9, %s1433_s30 }
  0x25   : > { %p1430_p3 = pnand %p1428_p1, %p1414_p2  ;;  %p1436_p5 = scmp.lt.s32.totalorder %s1434_s5, %s1427_s28 }
  0x27   : > { %p1431_p11 = pneg %p1430_p3  ;;  %p1437_p6 = por %p1436_p5, %p1435_p9 }
  0x29   : > { %p1438_p7 = pnand %p1437_p6, %p1431_p11 }
  0x2b   : > { %1441 = shalt.err (!%p1438_p7)
}
  0x2c   : > { %s1527_s6 = smov 512   ;;  %s1528_s8 = smov 256  }
  0x2d   : > { %s1529_s11 = smov 16   ;;  %p1269_p12 = scmp.ge.s32.totalorder %s1524_s17, 1 }
  0x2e   : > { %1324 = dma.hbm_to_vmem [thread:$0]  (!%p1623_p0), %s1630_s7, 1536, %s1632_s9, %s1634_s10, %s1527_s6, %s1528_s8, %s1529_s11  }
  0x2f   : > { %p208_p2 = scmp.lt.s32.totalorder %s1524_s17, 3 }
  0x31   : > { %p209_p4 = pnand %p1269_p12, %p208_p2 }
  0x32   : > { %s1665_s18 = sand.u32 (!%p209_p4), 1, %s1508_s13  }
  0x33   : > { %212 = sbr.rel (%p209_p4) target bundleno = 362 (0x16a), region = 32  ;;  %s215_s21 = scalar_lea.sflag (!%p209_p4), [#allocation4], %s1665_s18 }
  0x34   : > { %s1316_s19 = smul.u32 (!%p209_p4), 96, %s1665_s18 }
  0x36   : > { %s218_s22 = scalar_lea.vmem (!%p209_p4), [#allocation3], %s1316_s19 }
  0x3a   : > { %1495 = dma.done.wait (%p1602_p8), %s215_s21, 1536  }
  0x3b   : > { %1497 = vsyncadd (%p1602_p8), %s215_s21, 4294965760  ;;  %v1530_v0 = vmov 0   ;;  %v1386_v1 = vld [vmem:[%s218_s22 + $0x4] ss:$16 sps:$4 sm:$0xff]   ;;  %v1388_v2 = vld [vmem:[%s218_s22 + $0xc] ss:$16 sps:$4 sm:$0xff]   ;;  %v980_v21 = vlaneseq }
  0x3c   : > { %589 = vmatprep.mubr.bf16.mxu0 %v1530_v0  ;;  %702 = vmatprep.mubr.bf16.mxu1 %v1530_v0  ;;  %v1390_v3 = vld [vmem:[%s218_s22] ss:$16 sps:$4 sm:$0xff]   ;;  %v1391_v4 = vld [vmem:[%s218_s22 + $0x8] ss:$16 sps:$4 sm:$0xff]   ;;  %v1392_v5 = vld [vmem:[%s218_s22 + $0x24] ss:$16 sps:$4 sm:$0xff]  }
  0x3d   : > { %557 = vmatprep.subr.bf16.mxu0 %v1386_v1  ;;  %670 = vmatprep.subr.bf16.mxu1 %v1388_v2  ;;  %v1394_v6 = vld [vmem:[%s218_s22 + $0x2c] ss:$16 sps:$4 sm:$0xff]   ;;  %v1396_v7 = vld [vmem:[%s218_s22 + $0x20] ss:$16 sps:$4 sm:$0xff]   ;;  %v1397_v8 = vld [vmem:[%s218_s22 + $0x28] ss:$16 sps:$4 sm:$0xff]  }
  0x3e   : > { %558 = vmatpush1.bf16.msra.mxu0 %v1390_v3  ;;  %671 = vmatpush1.bf16.msra.mxu1 %v1391_v4  ;;  %v1398_v9 = vld [vmem:[%s218_s22 + $0x44] ss:$16 sps:$4 sm:$0xff]   ;;  %v1400_v10 = vld [vmem:[%s218_s22 + $0x4c] ss:$16 sps:$4 sm:$0xff]   ;;  %v1402_v11 = vld [vmem:[%s218_s22 + $0x40] ss:$16 sps:$4 sm:$0xff]  }
  0x3f   : > { %559 = vmatprep.subr.bf16.mxu0 %v1392_v5  ;;  %672 = vmatprep.subr.bf16.mxu1 %v1394_v6  ;;  %v1403_v12 = vld [vmem:[%s218_s22 + $0x48] ss:$16 sps:$4 sm:$0xff]   ;;  %v1404_v13 = vld [vmem:[%s1912_s0] sm:$0xff]   ;;  %vm532_vm0 = vcmask 392192   ;;  %v1406_v15 = vld [vmem:[%s1912_s0 + $0x10] sm:$0xff]   ;;  %s1271_s24 = sshll.u32 %s1516_s15, 2 }
  0x40   : > { %v1405_v14 = vld [vmem:[%s1912_s0 + $0x8] sm:$0xff]   ;;  %v1407_v16 = vld [vmem:[%s1912_s0 + $0x18] sm:$0xff]   ;;  %v1408_v17 = vld [vmem:[%s1912_s0 + $0x20] sm:$0xff]   ;;  %p265_p8 = scmp.lt.s32.totalorder %s1271_s24, 7  ;;  %v981_v22 = vshrl.u32 %v980_v21, 7  ;;  %s1270_s10 = sshll.u32 %s1665_s18, 9 }
  0x41   : > { %v1409_v18 = vld [vmem:[%s1912_s0 + $0x28] sm:$0xff]   ;;  %v1410_v19 = vld [vmem:[%s1912_s0 + $0x30] sm:$0xff]   ;;  %v1411_v20 = vld [vmem:[%s1912_s0 + $0x38] sm:$0xff]   ;;  %s1730_s23 = scalar_lea.vmem [#allocation6], %s1270_s10  ;;  %s1314_s28 = sshll.u32 %s1516_s15, 9 }
  0x42   : > { %560 = vmatpush1.bf16.msra.mxu0 %v1396_v7  ;;  %673 = vmatpush1.bf16.msra.mxu1 %v1397_v8  ;;  %s1933_s24 = smov (!%p265_p8, %s1271_s24), 7  ;;  %v982_v23 = vsub.s32 0, %v981_v22  ;;  %v990_v24 = vsub.s32 2, %v981_v22  ;;  %v986_v26 = vsub.s32 1, %v981_v22  ;;  %v994_v27 = vsub.s32 3, %v981_v22  ;;  %s1145_s29 = sshll.u32 %s1730_s23, 4  ;;  %s1855_s29 = int_to_ptr.vmem [resolvable:$true] %s1145_s29 }
  0x43   : > { %561 = vmatprep.subr.bf16.mxu0 %v1398_v9  ;;  %674 = vmatprep.subr.bf16.mxu1 %v1400_v10  ;;  %s267_s9 = scalar_lea.vmem %s1914_s2, %s1933_s24  ;;  %s1849_s5 = scalar_lea.hbm %s1915_s3, %s1314_s28 }
  0x44   : > { %v978_v25 = vld [vmem:[%s267_s9] sm:$0xf]  ;;  %s1129_s6 = scalar_lea.sflag [#allocation5], %s1665_s18  ;;  %s1442_s8 = scalar_lea.vmem %s1855_s29, 8192 }
  0x45   : > { %v1718_v28 = vrot.slane %v978_v25, %v982_v23  ;;  %v1720_v29 = vrot.slane %v978_v25, %v990_v24  ;;  %v1722_v30 = vrot.slane %v978_v25, %v986_v26  ;;  %v1724_v31 = vrot.slane %v978_v25, %v994_v27  ;;  %p1443_p9 = scmp.ne.s32.totalorder %s1855_s29, %s1442_s8  ;;  %p1922_p11 = scmp.ne.s32.totalorder %s1919_s25, 0 }
  0x46   : > { %562 = vmatpush1.bf16.msra.mxu0 %v1402_v11  ;;  %675 = vmatpush1.bf16.msra.mxu1 %v1403_v12  ;;  %s1531_s11 = smov [#allocation6]  }
  0x47   : > { %p1444_p0 = pnand %p1443_p9, %p1922_p11  ;;  %s1446_s19 = sshll.u32 %s1531_s11, 4  ;;  %s1447_s19 = int_to_ptr.vmem [resolvable:$false] %s1446_s19 }
  0x48   : > { %s1448_s21 = scalar_lea.vmem %s1447_s19, 16384  ;;  %p1449_p13 = scmp.lt.s32.totalorder %s1855_s29, %s1447_s19 }
  0x49   : > { %1292 = vmatmul.mubr.msk.bf16.vlgmr.msra.gmra.mrb[0].mxu0 %vm532_vm0, %v1404_v13  ;;  %1300 = vmatmul.mubr.msk.bf16.vlgmr.msra.gmra.mrb[0].mxu1 %vm532_vm0, %v1404_v13  ;;  %p1445_p10 = pneg %p1444_p0  ;;  %p1450_p1 = scmp.lt.s32.totalorder %s1448_s21, %s1442_s8 }
  0x4a   : > { %599 = vmatprep.mubr.bf16.mxu0 %v1530_v0  ;;  %712 = vmatprep.mubr.bf16.mxu1 %v1530_v0 }
  0x4b   : > { %p1451_p3 = por %p1450_p1, %p1449_p13 }
  0x4d   : > { %p1452_p5 = pnand %p1451_p3, %p1445_p10 }
  0x51   : > { %1293 = vmatmul.mubr.msk.bf16.gmra.mrb[4].mxu0 %vm532_vm0, %v1405_v14  ;;  %1301 = vmatmul.mubr.msk.bf16.gmra.mrb[4].mxu1 %vm532_vm0, %v1405_v14 }
  0x52   : > { %609 = vmatprep.mubr.bf16.mxu0 %v1530_v0  ;;  %722 = vmatprep.mubr.bf16.mxu1 %v1530_v0 }
  0x59   : > { %1294 = vmatmul.mubr.msk.bf16.gmra.mrb[8].mxu0 %vm532_vm0, %v1406_v15  ;;  %1302 = vmatmul.mubr.msk.bf16.gmra.mrb[8].mxu1 %vm532_vm0, %v1406_v15 }
  0x5a   : > { %619 = vmatprep.mubr.bf16.mxu0 %v1530_v0  ;;  %732 = vmatprep.mubr.bf16.mxu1 %v1530_v0 }
  0x61   : > { %1295 = vmatmul.mubr.msk.bf16.gmra.mrb[12].mxu0 %vm532_vm0, %v1407_v16  ;;  %1303 = vmatmul.mubr.msk.bf16.gmra.mrb[12].mxu1 %vm532_vm0, %v1407_v16 }
  0x62   : > { %629 = vmatprep.mubr.bf16.mxu0 %v1530_v0  ;;  %742 = vmatprep.mubr.bf16.mxu1 %v1530_v0 }
  0x69   : > { %1296 = vmatmul.mubr.msk.bf16.gmra.mrb[16].mxu0 %vm532_vm0, %v1408_v17  ;;  %1304 = vmatmul.mubr.msk.bf16.gmra.mrb[16].mxu1 %vm532_vm0, %v1408_v17 }
  0x6a   : > { %639 = vmatprep.mubr.bf16.mxu0 %v1530_v0  ;;  %752 = vmatprep.mubr.bf16.mxu1 %v1530_v0 }
  0x71   : > { %1297 = vmatmul.mubr.msk.bf16.gmra.mrb[20].mxu0 %vm532_vm0, %v1409_v18  ;;  %1305 = vmatmul.mubr.msk.bf16.gmra.mrb[20].mxu1 %vm532_vm0, %v1409_v18 }
  0x72   : > { %649 = vmatprep.mubr.bf16.mxu0 %v1530_v0  ;;  %762 = vmatprep.mubr.bf16.mxu1 %v1530_v0 }
  0x79   : > { %1298 = vmatmul.mubr.msk.bf16.gmra.mrb[24].mxu0 %vm532_vm0, %v1410_v19  ;;  %1306 = vmatmul.mubr.msk.bf16.gmra.mrb[24].mxu1 %vm532_vm0, %v1410_v19 }
  0x7a   : > { %659 = vmatprep.mubr.bf16.mxu0 %v1530_v0  ;;  %772 = vmatprep.mubr.bf16.mxu1 %v1530_v0 }
  0x81   : > { %1299 = vmatmul.mubr.msk.bf16.gmra.mrb[28].mxu0 %vm532_vm0, %v1411_v20  ;;  %1307 = vmatmul.mubr.msk.bf16.gmra.mrb[28].mxu1 %vm532_vm0, %v1411_v20 }
 0x11c   : > { %v591_v32 = vpop.f32.mrb[0].mxu0  ;;  %v704_v33 = vpop.f32.mrb[0].mxu1 }
 0x11d   : > { %v1000_v34 = vadd.f32 %v1718_v28, %v591_v32  ;;  %v1002_v35 = vadd.f32 %v1720_v29, %v704_v33  ;;  %v593_v36 = vpop.f32.mrb[1].mxu0  ;;  %v706_v37 = vpop.f32.mrb[1].mxu1 }
 0x11e   : > { %v1001_v38 = vadd.f32 %v1722_v30, %v593_v36  ;;  %v1003_v39 = vadd.f32 %v1724_v31, %v706_v37  ;;  %v595_v40 = vpop.f32.mrb[2].mxu0  ;;  %v708_v41 = vpop.f32.mrb[2].mxu1 }
 0x11f   : > { %1064 = vst [vmem:[%s1730_s23] sm:$0xff] %v1000_v34  ;;  %1066 = vst [vmem:[%s1730_s23 + $0x10] sm:$0xff] %v1002_v35  ;;  %v1004_v42 = vadd.f32 %v1718_v28, %v595_v40  ;;  %v1006_v43 = vadd.f32 %v1720_v29, %v708_v41  ;;  %v597_v44 = vpop.f32.mrb[3].mxu0  ;;  %v710_v45 = vpop.f32.mrb[3].mxu1 }
 0x120   : > { %1065 = vst [vmem:[%s1730_s23 + $0x8] sm:$0xff] %v1001_v38  ;;  %1067 = vst [vmem:[%s1730_s23 + $0x18] sm:$0xff] %v1003_v39  ;;  %v1005_v46 = vadd.f32 %v1722_v30, %v597_v44  ;;  %v1007_v47 = vadd.f32 %v1724_v31, %v710_v45 }
 0x121   : > { %1068 = vst [vmem:[%s1730_s23 + $0x20] sm:$0xff] %v1004_v42  ;;  %1070 = vst [vmem:[%s1730_s23 + $0x30] sm:$0xff] %v1006_v43 }
 0x122   : > { %1069 = vst [vmem:[%s1730_s23 + $0x28] sm:$0xff] %v1005_v46  ;;  %1071 = vst [vmem:[%s1730_s23 + $0x38] sm:$0xff] %v1007_v47 }
 0x124   : > { %v601_v48 = vpop.f32.mrb[4].mxu0  ;;  %v714_v49 = vpop.f32.mrb[4].mxu1 }
 0x125   : > { %v1008_v50 = vadd.f32 %v1718_v28, %v601_v48  ;;  %v1010_v51 = vadd.f32 %v1720_v29, %v714_v49  ;;  %v603_v52 = vpop.f32.mrb[5].mxu0  ;;  %v716_v53 = vpop.f32.mrb[5].mxu1 }
 0x126   : > { %v1009_v54 = vadd.f32 %v1722_v30, %v603_v52  ;;  %v1011_v55 = vadd.f32 %v1724_v31, %v716_v53  ;;  %v605_v56 = vpop.f32.mrb[6].mxu0  ;;  %v718_v57 = vpop.f32.mrb[6].mxu1 }
 0x127   : > { %1072 = vst [vmem:[%s1730_s23 + $0x40] sm:$0xff] %v1008_v50  ;;  %1074 = vst [vmem:[%s1730_s23 + $0x50] sm:$0xff] %v1010_v51  ;;  %v1012_v58 = vadd.f32 %v1718_v28, %v605_v56  ;;  %v1014_v59 = vadd.f32 %v1720_v29, %v718_v57  ;;  %v607_v60 = vpop.f32.mrb[7].mxu0  ;;  %v720_v61 = vpop.f32.mrb[7].mxu1 }
 0x128   : > { %1073 = vst [vmem:[%s1730_s23 + $0x48] sm:$0xff] %v1009_v54  ;;  %1075 = vst [vmem:[%s1730_s23 + $0x58] sm:$0xff] %v1011_v55  ;;  %v1013_v62 = vadd.f32 %v1722_v30, %v607_v60  ;;  %v1015_v63 = vadd.f32 %v1724_v31, %v720_v61 }
 0x129   : > { %1076 = vst [vmem:[%s1730_s23 + $0x60] sm:$0xff] %v1012_v58  ;;  %1078 = vst [vmem:[%s1730_s23 + $0x70] sm:$0xff] %v1014_v59 }
 0x12a   : > { %1077 = vst [vmem:[%s1730_s23 + $0x68] sm:$0xff] %v1013_v62  ;;  %1079 = vst [vmem:[%s1730_s23 + $0x78] sm:$0xff] %v1015_v63 }
 0x12c   : > { %v611_v0 = vpop.f32.mrb[8].mxu0  ;;  %v724_v1 = vpop.f32.mrb[8].mxu1 }
 0x12d   : > { %v1016_v2 = vadd.f32 %v1718_v28, %v611_v0  ;;  %v1018_v3 = vadd.f32 %v1720_v29, %v724_v1  ;;  %v613_v4 = vpop.f32.mrb[9].mxu0  ;;  %v726_v5 = vpop.f32.mrb[9].mxu1 }
 0x12e   : > { %v1017_v6 = vadd.f32 %v1722_v30, %v613_v4  ;;  %v1019_v7 = vadd.f32 %v1724_v31, %v726_v5  ;;  %v615_v8 = vpop.f32.mrb[10].mxu0  ;;  %v728_v9 = vpop.f32.mrb[10].mxu1 }
 0x12f   : > { %1080 = vst [vmem:[%s1730_s23 + $0x80] sm:$0xff] %v1016_v2  ;;  %1082 = vst [vmem:[%s1730_s23 + $0x90] sm:$0xff] %v1018_v3  ;;  %v1020_v10 = vadd.f32 %v1718_v28, %v615_v8  ;;  %v1022_v11 = vadd.f32 %v1720_v29, %v728_v9  ;;  %v617_v12 = vpop.f32.mrb[11].mxu0  ;;  %v730_v13 = vpop.f32.mrb[11].mxu1 }
 0x130   : > { %1081 = vst [vmem:[%s1730_s23 + $0x88] sm:$0xff] %v1017_v6  ;;  %1083 = vst [vmem:[%s1730_s23 + $0x98] sm:$0xff] %v1019_v7  ;;  %v1021_v14 = vadd.f32 %v1722_v30, %v617_v12  ;;  %v1023_v15 = vadd.f32 %v1724_v31, %v730_v13 }
 0x131   : > { %1084 = vst [vmem:[%s1730_s23 + $0xa0] sm:$0xff] %v1020_v10  ;;  %1086 = vst [vmem:[%s1730_s23 + $0xb0] sm:$0xff] %v1022_v11 }
 0x132   : > { %1085 = vst [vmem:[%s1730_s23 + $0xa8] sm:$0xff] %v1021_v14  ;;  %1087 = vst [vmem:[%s1730_s23 + $0xb8] sm:$0xff] %v1023_v15 }
 0x134   : > { %v621_v16 = vpop.f32.mrb[12].mxu0  ;;  %v734_v17 = vpop.f32.mrb[12].mxu1 }
 0x135   : > { %v1024_v18 = vadd.f32 %v1718_v28, %v621_v16  ;;  %v1026_v19 = vadd.f32 %v1720_v29, %v734_v17  ;;  %v623_v20 = vpop.f32.mrb[13].mxu0  ;;  %v736_v21 = vpop.f32.mrb[13].mxu1 }
 0x136   : > { %v1025_v22 = vadd.f32 %v1722_v30, %v623_v20  ;;  %v1027_v23 = vadd.f32 %v1724_v31, %v736_v21  ;;  %v625_v24 = vpop.f32.mrb[14].mxu0  ;;  %v738_v25 = vpop.f32.mrb[14].mxu1 }
 0x137   : > { %1088 = vst [vmem:[%s1730_s23 + $0xc0] sm:$0xff] %v1024_v18  ;;  %1090 = vst [vmem:[%s1730_s23 + $0xd0] sm:$0xff] %v1026_v19  ;;  %v1028_v26 = vadd.f32 %v1718_v28, %v625_v24  ;;  %v1030_v27 = vadd.f32 %v1720_v29, %v738_v25  ;;  %v627_v32 = vpop.f32.mrb[15].mxu0  ;;  %v740_v33 = vpop.f32.mrb[15].mxu1 }
 0x138   : > { %1089 = vst [vmem:[%s1730_s23 + $0xc8] sm:$0xff] %v1025_v22  ;;  %1091 = vst [vmem:[%s1730_s23 + $0xd8] sm:$0xff] %v1027_v23  ;;  %v1029_v34 = vadd.f32 %v1722_v30, %v627_v32  ;;  %v1031_v35 = vadd.f32 %v1724_v31, %v740_v33 }
 0x139   : > { %1092 = vst [vmem:[%s1730_s23 + $0xe0] sm:$0xff] %v1028_v26  ;;  %1094 = vst [vmem:[%s1730_s23 + $0xf0] sm:$0xff] %v1030_v27 }
 0x13a   : > { %1093 = vst [vmem:[%s1730_s23 + $0xe8] sm:$0xff] %v1029_v34  ;;  %1095 = vst [vmem:[%s1730_s23 + $0xf8] sm:$0xff] %v1031_v35 }
 0x13c   : > { %v631_v36 = vpop.f32.mrb[16].mxu0  ;;  %v744_v37 = vpop.f32.mrb[16].mxu1 }
 0x13d   : > { %v1032_v38 = vadd.f32 %v1718_v28, %v631_v36  ;;  %v1034_v39 = vadd.f32 %v1720_v29, %v744_v37  ;;  %v633_v40 = vpop.f32.mrb[17].mxu0  ;;  %v746_v41 = vpop.f32.mrb[17].mxu1 }
 0x13e   : > { %v1033_v42 = vadd.f32 %v1722_v30, %v633_v40  ;;  %v1035_v43 = vadd.f32 %v1724_v31, %v746_v41  ;;  %v635_v44 = vpop.f32.mrb[18].mxu0  ;;  %v748_v45 = vpop.f32.mrb[18].mxu1 }
 0x13f   : > { %1096 = vst [vmem:[%s1730_s23 + $0x100] sm:$0xff] %v1032_v38  ;;  %1098 = vst [vmem:[%s1730_s23 + $0x110] sm:$0xff] %v1034_v39  ;;  %v1036_v46 = vadd.f32 %v1718_v28, %v635_v44  ;;  %v1038_v47 = vadd.f32 %v1720_v29, %v748_v45  ;;  %v637_v48 = vpop.f32.mrb[19].mxu0  ;;  %v750_v49 = vpop.f32.mrb[19].mxu1 }
 0x140   : > { %1097 = vst [vmem:[%s1730_s23 + $0x108] sm:$0xff] %v1033_v42  ;;  %1099 = vst [vmem:[%s1730_s23 + $0x118] sm:$0xff] %v1035_v43  ;;  %v1037_v50 = vadd.f32 %v1722_v30, %v637_v48  ;;  %v1039_v51 = vadd.f32 %v1724_v31, %v750_v49 }
 0x141   : > { %1100 = vst [vmem:[%s1730_s23 + $0x120] sm:$0xff] %v1036_v46  ;;  %1102 = vst [vmem:[%s1730_s23 + $0x130] sm:$0xff] %v1038_v47 }
 0x142   : > { %1101 = vst [vmem:[%s1730_s23 + $0x128] sm:$0xff] %v1037_v50  ;;  %1103 = vst [vmem:[%s1730_s23 + $0x138] sm:$0xff] %v1039_v51 }
 0x144   : > { %v641_v52 = vpop.f32.mrb[20].mxu0  ;;  %v754_v53 = vpop.f32.mrb[20].mxu1 }
 0x145   : > { %v1040_v54 = vadd.f32 %v1718_v28, %v641_v52  ;;  %v1042_v55 = vadd.f32 %v1720_v29, %v754_v53  ;;  %v643_v56 = vpop.f32.mrb[21].mxu0  ;;  %v756_v57 = vpop.f32.mrb[21].mxu1 }
 0x146   : > { %v1041_v58 = vadd.f32 %v1722_v30, %v643_v56  ;;  %v1043_v59 = vadd.f32 %v1724_v31, %v756_v57  ;;  %v645_v60 = vpop.f32.mrb[22].mxu0  ;;  %v758_v61 = vpop.f32.mrb[22].mxu1 }
 0x147   : > { %1104 = vst [vmem:[%s1730_s23 + $0x140] sm:$0xff] %v1040_v54  ;;  %1106 = vst [vmem:[%s1730_s23 + $0x150] sm:$0xff] %v1042_v55  ;;  %v1044_v62 = vadd.f32 %v1718_v28, %v645_v60  ;;  %v1046_v63 = vadd.f32 %v1720_v29, %v758_v61  ;;  %v647_v0 = vpop.f32.mrb[23].mxu0  ;;  %v760_v1 = vpop.f32.mrb[23].mxu1 }
 0x148   : > { %1105 = vst [vmem:[%s1730_s23 + $0x148] sm:$0xff] %v1041_v58  ;;  %1107 = vst [vmem:[%s1730_s23 + $0x158] sm:$0xff] %v1043_v59  ;;  %v1045_v2 = vadd.f32 %v1722_v30, %v647_v0  ;;  %v1047_v3 = vadd.f32 %v1724_v31, %v760_v1 }
 0x149   : > { %1108 = vst [vmem:[%s1730_s23 + $0x160] sm:$0xff] %v1044_v62  ;;  %1110 = vst [vmem:[%s1730_s23 + $0x170] sm:$0xff] %v1046_v63 }
 0x14a   : > { %1109 = vst [vmem:[%s1730_s23 + $0x168] sm:$0xff] %v1045_v2  ;;  %1111 = vst [vmem:[%s1730_s23 + $0x178] sm:$0xff] %v1047_v3 }
 0x14c   : > { %v651_v4 = vpop.f32.mrb[24].mxu0  ;;  %v764_v5 = vpop.f32.mrb[24].mxu1 }
 0x14d   : > { %v1048_v6 = vadd.f32 %v1718_v28, %v651_v4  ;;  %v1050_v7 = vadd.f32 %v1720_v29, %v764_v5  ;;  %v653_v8 = vpop.f32.mrb[25].mxu0  ;;  %v766_v9 = vpop.f32.mrb[25].mxu1 }
 0x14e   : > { %v1049_v10 = vadd.f32 %v1722_v30, %v653_v8  ;;  %v1051_v11 = vadd.f32 %v1724_v31, %v766_v9  ;;  %v655_v12 = vpop.f32.mrb[26].mxu0  ;;  %v768_v13 = vpop.f32.mrb[26].mxu1 }
 0x14f   : > { %1112 = vst [vmem:[%s1730_s23 + $0x180] sm:$0xff] %v1048_v6  ;;  %1114 = vst [vmem:[%s1730_s23 + $0x190] sm:$0xff] %v1050_v7  ;;  %v1052_v14 = vadd.f32 %v1718_v28, %v655_v12  ;;  %v1054_v15 = vadd.f32 %v1720_v29, %v768_v13  ;;  %v657_v16 = vpop.f32.mrb[27].mxu0  ;;  %v770_v17 = vpop.f32.mrb[27].mxu1 }
 0x150   : > { %1113 = vst [vmem:[%s1730_s23 + $0x188] sm:$0xff] %v1049_v10  ;;  %1115 = vst [vmem:[%s1730_s23 + $0x198] sm:$0xff] %v1051_v11  ;;  %v1053_v18 = vadd.f32 %v1722_v30, %v657_v16  ;;  %v1055_v19 = vadd.f32 %v1724_v31, %v770_v17 }
 0x151   : > { %1116 = vst [vmem:[%s1730_s23 + $0x1a0] sm:$0xff] %v1052_v14  ;;  %1118 = vst [vmem:[%s1730_s23 + $0x1b0] sm:$0xff] %v1054_v15 }
 0x152   : > { %1117 = vst [vmem:[%s1730_s23 + $0x1a8] sm:$0xff] %v1053_v18  ;;  %1119 = vst [vmem:[%s1730_s23 + $0x1b8] sm:$0xff] %v1055_v19 }
 0x154   : > { %v661_v20 = vpop.f32.mrb[28].mxu0  ;;  %v774_v21 = vpop.f32.mrb[28].mxu1 }
 0x155   : > { %v1056_v22 = vadd.f32 %v1718_v28, %v661_v20  ;;  %v1058_v23 = vadd.f32 %v1720_v29, %v774_v21  ;;  %v663_v24 = vpop.f32.mrb[29].mxu0  ;;  %v776_v25 = vpop.f32.mrb[29].mxu1 }
 0x156   : > { %v1057_v26 = vadd.f32 %v1722_v30, %v663_v24  ;;  %v1059_v27 = vadd.f32 %v1724_v31, %v776_v25  ;;  %v665_v32 = vpop.f32.mrb[30].mxu0  ;;  %v778_v33 = vpop.f32.mrb[30].mxu1 }
 0x157   : > { %1120 = vst [vmem:[%s1730_s23 + $0x1c0] sm:$0xff] %v1056_v22  ;;  %1122 = vst [vmem:[%s1730_s23 + $0x1d0] sm:$0xff] %v1058_v23  ;;  %v1060_v34 = vadd.f32 %v1718_v28, %v665_v32  ;;  %v1062_v35 = vadd.f32 %v1720_v29, %v778_v33  ;;  %v667_v36 = vpop.f32.mrb[31].mxu0  ;;  %v780_v37 = vpop.f32.mrb[31].mxu1 }
 0x158   : > { %1121 = vst [vmem:[%s1730_s23 + $0x1c8] sm:$0xff] %v1057_v26  ;;  %1123 = vst [vmem:[%s1730_s23 + $0x1d8] sm:$0xff] %v1059_v27  ;;  %v1061_v38 = vadd.f32 %v1722_v30, %v667_v36  ;;  %v1063_v39 = vadd.f32 %v1724_v31, %v780_v37 }
 0x159   : > { %1124 = vst [vmem:[%s1730_s23 + $0x1e0] sm:$0xff] %v1060_v34  ;;  %1126 = vst [vmem:[%s1730_s23 + $0x1f0] sm:$0xff] %v1062_v35 }
 0x15a   : > { %1125 = vst [vmem:[%s1730_s23 + $0x1e8] sm:$0xff] %v1061_v38  ;;  %1127 = vst [vmem:[%s1730_s23 + $0x1f8] sm:$0xff] %v1063_v39 }
 0x15b   : > { %1455 = shalt.err (!%p1452_p5)
}
 0x15c   : > { %s1456_s22 = scalar_lea.hbm %s1849_s5, 8192  ;;  %s1460_s7 = scalar_lea.hbm %s1915_s3, 16384 }
 0x15d   : > { %p1457_p6 = scmp.ne.s32.totalorder %s1849_s5, %s1456_s22  ;;  %p1461_p2 = scmp.lt.u32.totalorder %s1849_s5, %s1915_s3 }
 0x15e   : > { %p1462_p4 = scmp.lt.u32.totalorder %s1460_s7, %s1456_s22  ;;  %p1464_p9 = scmp.lt.u32.totalorder %s1456_s22, %s1849_s5 }
 0x15f   : > { %p1458_p7 = pnand %p1457_p6, %p1922_p11 }
 0x160   : > { %p1463_p8 = por %p1462_p4, %p1461_p2 }
 0x161   : > { %p1459_p12 = pneg %p1458_p7 }
 0x162   : > { %p1465_p0 = por %p1464_p9, %p1463_p8 }
 0x164   : > { %p1466_p10 = pnand %p1465_p0, %p1459_p12 }
 0x166   : > { %1469 = shalt.err (!%p1466_p10)
}
 0x167   : > { %s1532_s23 = smov 512   ;;  %s1533_s28 = smov 1024  }
 0x168   : > { %s1534_s15 = smov 32  }
 0x169   : > { %1319 = dma.vmem_to_hbm [thread:$0]  (%p1922_p11), %s1855_s29, 8192, %s1849_s5, %s1129_s6, %s1532_s23, %s1533_s28, %s1534_s15  }
 0x16a PF: > { %s1160_s30 = sand.u32 1, %s1504_s12   ;;  %p1923_p13 = scmp.ne.s32.totalorder %s1920_s27, 0 }
 0x16b   : > { %p1924_p1 = scmp.ge.s32.totalorder %s1524_s17, 2  ;;  %s1161_s8 = scalar_lea.sflag [#allocation5], %s1160_s30 }
 0x16d   : > { %p1326_p3 = pnand %p1924_p1, %p1923_p13 }
 0x16f   : > { %1499 = dma.done.wait (!%p1326_p3), %s1161_s8, 8192  }
 0x170   : > { %1501 = vsyncadd (!%p1326_p3), %s1161_s8, 4294959104  ;;  %s19_s17 = sadd.s32 1, %s1524_s17   ;;  %s1925_s12 = smov %s1508_s13 }
 0x171   : > { %p16_p5 = scmp.ge.s32.totalorder %s19_s17, 4   ;;  %s1926_s13 = smov %s1512_s14 }
 0x172   : > { %s1927_s14 = smov %s1611_s26  ;;  %s1928_s15 = smov %s1520_s16 }
 0x173   : > { %s1929_s16 = smov %s1931_s20  ;;  %18 = sbr.rel (!%p16_p5) target bundleno = 6 (0x6), region = 91 }
 0x17a   :  { %1166 = vsyncpa [#allocation4], 1 }
 0x17b   :  { %1168 = vsyncpa [#allocation4 + $0x1], 1 }
 0x17c   :  { %1169 = vsyncpa [#allocation5], 1 }
 0x17d   :  { %1171 = vsyncpa [#allocation5 + $0x1], 1 }

</bundles_post_ra>
